<compile_context>
chip_gen: v5e
topology: v5e:2x2
jax: 0.10.0
libtpu: 0.0.40
codegen_flags: <defaults>
</compile_context>

<pallas_src>
import functools

import jax
import jax.numpy as jnp
from jax.experimental import pallas as pl
from jax.experimental.pallas import tpu as pltpu

EPS = 1e-07
NEG_INF = -1e30


def _round_up(x, m):
    return ((x + m - 1) // m) * m


# ---------------------------------------------------------------------------
# Phase 1: per-(trajectory, step) policy score + per-trajectory
#          log p(tau, O) - log p(O).  Grid over blocks of BS trajectories
#          (BS*T MLP rows per step), dimension_semantics=("parallel",).
# ---------------------------------------------------------------------------
def phi_wake_block_kernel(s_ref, a_ref, oc_ref, rw_ref, op_ref, lp_ref, l1p_ref,
                          w1s_ref, w1a_ref, w1o_ref, b1_ref, w2_ref,
                          g_ref, base_ref):
    # Policy hidden layer on the MXU.  No feature concat: two narrow matmuls
    # plus a rank-1 optimality term and a broadcast bias reproduce
    # x @ W1 + b1 exactly, straight from the un-copied HBM inputs.
    pre = jnp.dot(s_ref[...], w1s_ref[...], preferred_element_type=jnp.float32)
    pre = pre + jnp.dot(a_ref[...], w1a_ref[...],
                        preferred_element_type=jnp.float32)
    pre = pre + oc_ref[...] * w1o_ref[...]          # [R,1]*[1,H] -> [R,H]
    pre = pre + b1_ref[...]                         # [1,H] broadcast add
    h = jnp.tanh(pre)                               # [R, H]

    # Per-row policy score: W2 folded in via a lane reduction (no 1-lane
    # [R,H]@[H,1] matmul).  The per-trajectory time sum happens in the
    # finalize kernel on a lane-dense [S_pad, T] view of this column.
    g_ref[...] = jnp.sum(h * w2_ref[...], axis=-1, keepdims=True)    # [R, 1]

    # Lane-dense [BS, T] elementwise math (trajectory on sublanes, time on
    # lanes) -> lane reductions for the per-trajectory sums.
    r = rw_ref[...]
    o = op_ref[...]

    # log p(tau, O): optimality variables are 0/1 indicators.  The where()
    # guard deliberately diverges from the reference's (1-o)*log(1-exp(r))
    # form only where r >= 0 would make that term NaN on o == 1 rows.
    joint = jnp.where(o > 0.0, r, jnp.log(1.0 - jnp.exp(r) + EPS))
    log_joint = jnp.sum(joint, axis=-1, keepdims=True)               # [BS, 1]

    # log p(O)
    logopt = o * lp_ref[...] + (1.0 - o) * l1p_ref[...]              # [BS, T]
    log_opt = jnp.sum(logopt, axis=-1, keepdims=True)                # [BS, 1]

    # Everything per-trajectory except the policy-score sum.  The constant
    # shifts -log(total_samples) and -T*b2 cancel in the self-normalized
    # softmax, so they are dropped here (T*b2 re-enters the objective exactly
    # once, in the finalize).
    base_ref[...] = log_joint - log_opt


# ---------------------------------------------------------------------------
# Phase 2: per-trajectory score sum, self-normalized importance weights
#          (normalize == 1) and the objective.  Tiny O(S*T) epilogue.
# ---------------------------------------------------------------------------
def phi_wake_finalize_kernel(g_ref, base_ref, tb2_ref, obj_ref, nz_ref,
                             *, s_actual):
    # per-trajectory sum over time of the policy score (lane reduction over T)
    ss = jnp.sum(g_ref[...], axis=-1, keepdims=True)                 # [S_pad,1]
    iw = base_ref[...] - ss                                          # [S_pad,1]

    s_pad = iw.shape[0]
    if s_pad > s_actual:
        # Trajectories beyond S come from out-of-bounds reads of the last
        # (partial) grid block -> unspecified values, possibly NaN; the
        # select keeps them out of the softmax and the objective.
        sid = jax.lax.broadcasted_iota(jnp.int32, iw.shape, 0)
        valid = sid < s_actual
        iw = jnp.where(valid, iw, NEG_INF)
        ss = jnp.where(valid, ss, 0.0)

    # normalize == 1 branch: self-normalized softmax over trajectories.
    m = jnp.max(iw, axis=0, keepdims=True)
    w = jnp.exp(iw - m)
    tiw = w / jnp.sum(w, axis=0, keepdims=True)                      # [S_pad,1]

    # objective: -<total_iw, total_score> (trust_region_reg != 1 => TRR == 0).
    # sum(tiw) == 1, so the per-trajectory T*b2 term of the score contributes
    # exactly once.
    obj_ref[...] = -(jnp.sum(tiw * ss, axis=0, keepdims=True) + tb2_ref[...])

    # torch.nonzero(total_iw).size(0); padded weights are exactly 0.
    nz = jnp.sum((tiw != 0.0).astype(jnp.float32), axis=0, keepdims=True)
    nz_ref[...] = nz.astype(jnp.int32)


# ---------------------------------------------------------------------------
# Wrapper: block sizing, zero-copy layout views, two pallas_calls.
# ---------------------------------------------------------------------------
def phi_wake_forward(params, state, action, reward, optimality, probabilities,
                     *, target_rows=4096):
    """Returns (objective, n_nonzero_weights, n_weights) like PHI_WAKE.forward."""
    S, T, Ds = state.shape
    Da = action.shape[-1]
    w1, b1, w2, b2 = params
    H = w1.shape[-1]
    f32 = jnp.float32

    # ---- block sizing: amortize the ~0.35us per-grid-step overhead with
    # ~4K MLP rows per step, stay inside a conservative VMEM budget (the
    # narrow feature blocks are lane-padded to 128 lanes, i.e. ~512 B/row
    # each in VMEM; v7x has only 64 MiB physical VMEM), and keep >= 2 blocks
    # whenever S allows so the "parallel" axis can feed both v7x TCs. ----
    max_rows = 6144                       # (3 in + 1 out) dbl-buffered 512B/row blocks << 48 MiB
    rows_tgt = max(8, min(int(target_rows), max_rows))
    bs = max(8, _round_up(max(1, rows_tgt // T), 8))
    bs = min(bs, _round_up(S, 8))
    if S > 8:
        bs = min(bs, _round_up(pl.cdiv(S, 2), 8))   # nblk >= 2 (v7x megacore)
    nblk = pl.cdiv(S, bs)
    s_pad = nblk * bs
    rows = bs * T

    # ---- zero-copy layout views (row-major reshapes / squeezes only -> no
    # HBM copies; this replaces the old concat/pad/reshape of x). ----
    s2 = state.astype(f32).reshape(S * T, Ds)
    a2 = action.astype(f32).reshape(S * T, Da)
    oc = optimality.astype(f32).reshape(S * T, 1)
    rw = reward.astype(f32).reshape(S, T)
    op = optimality.astype(f32).reshape(S, T)
    lp = jnp.log(probabilities.astype(f32) + EPS).reshape(1, T)
    l1p = jnp.log(1.0 - probabilities.astype(f32) + EPS).reshape(1, T)

    w1f = w1.astype(f32)
    w1s = w1f[:Ds, :]                     # W1 rows for the state features
    w1a = w1f[Ds:Ds + Da, :]              # W1 rows for the action features
    w1o = w1f[Ds + Da:Ds + Da + 1, :]     # W1 row for the optimality feature
    b1r = b1.astype(f32).reshape(1, H)
    w2r = w2.astype(f32).reshape(1, H)
    tb2 = (jnp.float32(T) * b2.astype(f32)).reshape(1, 1)

    g_col, base = pl.pallas_call(
        phi_wake_block_kernel,
        grid=(nblk,),
        in_specs=[
            pl.BlockSpec((rows, Ds), lambda i: (i, 0)),    # state rows
            pl.BlockSpec((rows, Da), lambda i: (i, 0)),    # action rows
            pl.BlockSpec((rows, 1), lambda i: (i, 0)),     # optimality rows
            pl.BlockSpec((bs, T), lambda i: (i, 0)),       # reward     [S, T]
            pl.BlockSpec((bs, T), lambda i: (i, 0)),       # optimality [S, T]
            pl.BlockSpec((1, T), lambda i: (0, 0)),        # log p(O=1)
            pl.BlockSpec((1, T), lambda i: (0, 0)),        # log p(O=0)
            pl.BlockSpec((Ds, H), lambda i: (0, 0)),       # W1[state]
            pl.BlockSpec((Da, H), lambda i: (0, 0)),       # W1[action]
            pl.BlockSpec((1, H), lambda i: (0, 0)),        # W1[optimality]
            pl.BlockSpec((1, H), lambda i: (0, 0)),        # b1
            pl.BlockSpec((1, H), lambda i: (0, 0)),        # W2 row
        ],
        out_specs=(pl.BlockSpec((rows, 1), lambda i: (i, 0)),
                   pl.BlockSpec((bs, 1), lambda i: (i, 0))),
        out_shape=(jax.ShapeDtypeStruct((s_pad * T, 1), f32),
                   jax.ShapeDtypeStruct((s_pad, 1), f32)),
        compiler_params=pltpu.CompilerParams(
            dimension_semantics=("parallel",),
            vmem_limit_bytes=48 * 1024 * 1024),
    )(s2, a2, oc, rw, op, lp, l1p, w1s, w1a, w1o, b1r, w2r)

    # Free (bitcast) reshape: per-(trajectory, step) score column -> lane-dense
    # [S_pad, T] view for the finalize's per-trajectory time reduction.
    g2 = g_col.reshape(s_pad, T)

    fin_kernel = functools.partial(phi_wake_finalize_kernel, s_actual=S)
    vmem = pl.BlockSpec(memory_space=pltpu.MemorySpace.VMEM)
    obj, nz = pl.pallas_call(
        fin_kernel,
        in_specs=[vmem, vmem, vmem],
        out_specs=(vmem, vmem),
        out_shape=(jax.ShapeDtypeStruct((1, 1), f32),
                   jax.ShapeDtypeStruct((1, 1), jnp.int32)),
    )(g2, base, tb2)

    return obj[0, 0], nz[0, 0], S


# ---------------------------------------------------------------------------
# Pure-JAX mirror of the PyTorch forward (normalize == 1, no buffer).
# ---------------------------------------------------------------------------
def phi_wake_reference(params, state, action, reward, optimality, probabilities):
    S, T, _ = state.shape
    w1, b1, w2, b2 = params
    x = jnp.concatenate([state, action, optimality], axis=-1).reshape(S * T, -1)
    h = jnp.tanh(x @ w1 + b1)
    score = (h @ w2 + b2).reshape(S, T)
    sum_score = jnp.sum(score, axis=1)

    r = reward[..., 0]
    o = optimality[..., 0]
    subopt = jnp.log(1.0 - jnp.exp(r) + EPS)
    log_joint = jnp.sum((1.0 - o) * subopt + o * r, axis=1)
    log_opt = (o @ jnp.log(probabilities + EPS)
               + (1.0 - o) @ jnp.log(1.0 - probabilities + EPS))

    iw = log_joint - sum_score - log_opt - jnp.log(jnp.float32(S))
    iw = iw - jnp.max(iw)
    tiw = jnp.exp(iw) / jnp.sum(jnp.exp(iw))
    obj = -jnp.dot(tiw, sum_score)
    return obj, jnp.sum(tiw != 0.0), S


if __name__ == "__main__":
    # Small shapes implied by the module: S simulations, T trajectory steps,
    # per-step state / action features, 1-dim reward & optimality indicator.
    # S=20 gives a 2-step grid with a partial last block (exercises OOB
    # masking); T=10 exercises a non-8-aligned time axis.
    S, T, Ds, Da, H = 20, 10, 6, 4, 32
    Din = Ds + Da + 1

    key = jax.random.PRNGKey(0)
    k_s, k_a, k_r, k_o, k_p, k_w1, k_w2 = jax.random.split(key, 7)

    state = jax.random.normal(k_s, (S, T, Ds), dtype=jnp.float32)
    action = jax.random.normal(k_a, (S, T, Da), dtype=jnp.float32)
    # rewards are log-probabilities (exp(r) < 1 so log(1-exp(r)) is defined)
    reward = jax.nn.log_sigmoid(jax.random.normal(k_r, (S, T, 1))).astype(jnp.float32)
    optimality = jax.random.bernoulli(k_o, 0.7, (S, T, 1)).astype(jnp.float32)
    probabilities = jax.random.uniform(k_p, (T,), minval=0.05, maxval=0.95,
                                       dtype=jnp.float32)

    # deterministic "policy" parameters (synthetic, not a checkpoint);
    # non-zero biases so the bias / b2-folding paths are actually exercised.
    w1 = 0.1 * jax.random.normal(k_w1, (Din, H), dtype=jnp.float32)
    b1 = 0.05 * jnp.ones((1, H), dtype=jnp.float32)
    w2 = 0.1 * jax.random.normal(k_w2, (H, 1), dtype=jnp.float32)
    b2 = 0.02 * jnp.ones((1, 1), dtype=jnp.float32)
    params = (w1, b1, w2, b2)

    obj, nz, n_total = phi_wake_forward(params, state, action, reward,
                                        optimality, probabilities)
    obj = jax.block_until_ready(obj)
    nz = jax.block_until_ready(nz)

    obj_ref, nz_ref, _ = phi_wake_reference(params, state, action, reward,
                                            optimality, probabilities)

    assert jnp.allclose(obj, obj_ref, rtol=1e-4, atol=1e-4), (obj, obj_ref)
    assert int(nz) == int(nz_ref), (nz, nz_ref)
    assert n_total == S

    print("KERNEL_OK")
</pallas_src>

<mosaic_0001>
module attributes {stable_mosaic.version = 11 : i64} {
  func.func @phi_wake_block_kernel(%arg0: i32, %arg1: memref<160x6xf32, #tpu.memory_space<vmem>>, %arg2: memref<160x4xf32, #tpu.memory_space<vmem>>, %arg3: memref<160x1xf32, #tpu.memory_space<vmem>>, %arg4: memref<16x10xf32, #tpu.memory_space<vmem>>, %arg5: memref<16x10xf32, #tpu.memory_space<vmem>>, %arg6: memref<1x10xf32, #tpu.memory_space<vmem>>, %arg7: memref<1x10xf32, #tpu.memory_space<vmem>>, %arg8: memref<6x32xf32, #tpu.memory_space<vmem>>, %arg9: memref<4x32xf32, #tpu.memory_space<vmem>>, %arg10: memref<1x32xf32, #tpu.memory_space<vmem>>, %arg11: memref<1x32xf32, #tpu.memory_space<vmem>>, %arg12: memref<1x32xf32, #tpu.memory_space<vmem>>, %arg13: memref<160x1xf32, #tpu.memory_space<vmem>>, %arg14: memref<16x1xf32, #tpu.memory_space<vmem>>) attributes {dimension_semantics = [#tpu.dimension_semantics<parallel>], iteration_bounds = array<i64: 2>, scalar_prefetch = 0 : i64, scratch_operands = 0 : i64, tpu.core_type = #tpu.core_type<tc>, window_params = [{transform_indices = @transform_0, window_bounds = array<i64: 160, 6>}, {transform_indices = @transform_1, window_bounds = array<i64: 160, 4>}, {transform_indices = @transform_2, window_bounds = array<i64: 160, 1>}, {transform_indices = @transform_3, window_bounds = array<i64: 16, 10>}, {transform_indices = @transform_4, window_bounds = array<i64: 16, 10>}, {pipeline_mode = #tpu.pipeline_mode<synchronous>, transform_indices = @transform_5, window_bounds = array<i64: 1, 10>}, {pipeline_mode = #tpu.pipeline_mode<synchronous>, transform_indices = @transform_6, window_bounds = array<i64: 1, 10>}, {pipeline_mode = #tpu.pipeline_mode<synchronous>, transform_indices = @transform_7, window_bounds = array<i64: 6, 32>}, {pipeline_mode = #tpu.pipeline_mode<synchronous>, transform_indices = @transform_8, window_bounds = array<i64: 4, 32>}, {pipeline_mode = #tpu.pipeline_mode<synchronous>, transform_indices = @transform_9, window_bounds = array<i64: 1, 32>}, {pipeline_mode = #tpu.pipeline_mode<synchronous>, transform_indices = @transform_10, window_bounds = array<i64: 1, 32>}, {pipeline_mode = #tpu.pipeline_mode<synchronous>, transform_indices = @transform_11, window_bounds = array<i64: 1, 32>}, {transform_indices = @transform_12, window_bounds = array<i64: 160, 1>}, {transform_indices = @transform_13, window_bounds = array<i64: 16, 1>}]} {
    %c0 = arith.constant 0 : index
    %c0_0 = arith.constant 0 : index
    %0 = vector.load %arg1[%c0, %c0_0] : memref<160x6xf32, #tpu.memory_space<vmem>>, vector<160x6xf32>
    %c0_1 = arith.constant 0 : index
    %c0_2 = arith.constant 0 : index
    %1 = vector.load %arg8[%c0_1, %c0_2] : memref<6x32xf32, #tpu.memory_space<vmem>>, vector<6x32xf32>
    %cst = arith.constant dense<0.000000e+00> : vector<160x32xf32>
    %2 = tpu.matmul %0, %1, %cst {dimension_numbers = #tpu.dot_dimension_numbers<[1], [0], [0], [1], [0, 0, 1, 1], [], []>} : vector<160x6xf32>, vector<6x32xf32>, vector<160x32xf32> -> vector<160x32xf32>
    %c0_3 = arith.constant 0 : index
    %c0_4 = arith.constant 0 : index
    %3 = vector.load %arg2[%c0_3, %c0_4] : memref<160x4xf32, #tpu.memory_space<vmem>>, vector<160x4xf32>
    %c0_5 = arith.constant 0 : index
    %c0_6 = arith.constant 0 : index
    %4 = vector.load %arg9[%c0_5, %c0_6] : memref<4x32xf32, #tpu.memory_space<vmem>>, vector<4x32xf32>
    %cst_7 = arith.constant dense<0.000000e+00> : vector<160x32xf32>
    %5 = tpu.matmul %3, %4, %cst_7 {dimension_numbers = #tpu.dot_dimension_numbers<[1], [0], [0], [1], [0, 0, 1, 1], [], []>} : vector<160x4xf32>, vector<4x32xf32>, vector<160x32xf32> -> vector<160x32xf32>
    %6 = arith.addf %2, %5 : vector<160x32xf32>
    %c0_8 = arith.constant 0 : index
    %c0_9 = arith.constant 0 : index
    %7 = vector.load %arg3[%c0_8, %c0_9] : memref<160x1xf32, #tpu.memory_space<vmem>>, vector<160x1xf32>
    %c0_10 = arith.constant 0 : index
    %c0_11 = arith.constant 0 : index
    %8 = vector.load %arg10[%c0_10, %c0_11] : memref<1x32xf32, #tpu.memory_space<vmem>>, vector<1x32xf32>
    %9 = vector.broadcast %7 : vector<160x1xf32> to vector<160x32xf32>
    %10 = vector.broadcast %8 : vector<1x32xf32> to vector<160x32xf32>
    %11 = arith.mulf %9, %10 : vector<160x32xf32>
    %12 = arith.addf %6, %11 : vector<160x32xf32>
    %c0_12 = arith.constant 0 : index
    %c0_13 = arith.constant 0 : index
    %13 = vector.load %arg11[%c0_12, %c0_13] : memref<1x32xf32, #tpu.memory_space<vmem>>, vector<1x32xf32>
    %14 = vector.broadcast %13 : vector<1x32xf32> to vector<160x32xf32>
    %15 = arith.addf %12, %14 : vector<160x32xf32>
    %16 = math.tanh %15 : vector<160x32xf32>
    %c0_14 = arith.constant 0 : index
    %c0_15 = arith.constant 0 : index
    %17 = vector.load %arg12[%c0_14, %c0_15] : memref<1x32xf32, #tpu.memory_space<vmem>>, vector<1x32xf32>
    %18 = vector.broadcast %17 : vector<1x32xf32> to vector<160x32xf32>
    %19 = arith.mulf %16, %18 : vector<160x32xf32>
    %cst_16 = arith.constant dense<0.000000e+00> : vector<160xf32>
    %20 = vector.multi_reduction <add>, %19, %cst_16 [1] : vector<160x32xf32> to vector<160xf32>
    %21 = vector.shape_cast %20 : vector<160xf32> to vector<160x1xf32>
    %c0_17 = arith.constant 0 : index
    %c0_18 = arith.constant 0 : index
    %22 = vector.load %arg13[%c0_17, %c0_18] : memref<160x1xf32, #tpu.memory_space<vmem>>, vector<160x1xf32>
    tpu.vector_store %arg13[%c0_17, %c0_18], %21 {strides = array<i32>} : memref<160x1xf32, #tpu.memory_space<vmem>>, vector<160x1xf32>,
    %c0_19 = arith.constant 0 : index
    %c0_20 = arith.constant 0 : index
    %23 = vector.load %arg4[%c0_19, %c0_20] : memref<16x10xf32, #tpu.memory_space<vmem>>, vector<16x10xf32>
    %c0_21 = arith.constant 0 : index
    %c0_22 = arith.constant 0 : index
    %24 = vector.load %arg5[%c0_21, %c0_22] : memref<16x10xf32, #tpu.memory_space<vmem>>, vector<16x10xf32>
    %cst_23 = arith.constant 0.000000e+00 : f32
    %25 = vector.broadcast %cst_23 : f32 to vector<16x10xf32>
    %26 = arith.cmpf ogt, %24, %25 : vector<16x10xf32>
    %27 = math.exp %23 : vector<16x10xf32>
    %cst_24 = arith.constant 1.000000e+00 : f32
    %28 = vector.broadcast %cst_24 : f32 to vector<16x10xf32>
    %29 = arith.subf %28, %27 : vector<16x10xf32>
    %cst_25 = arith.constant 1.000000e-07 : f32
    %30 = vector.broadcast %cst_25 : f32 to vector<16x10xf32>
    %31 = arith.addf %29, %30 : vector<16x10xf32>
    %32 = math.log %31 : vector<16x10xf32>
    %33 = arith.select %26, %23, %32 : vector<16x10xi1>, vector<16x10xf32>
    %cst_26 = arith.constant dense<0.000000e+00> : vector<16xf32>
    %34 = vector.multi_reduction <add>, %33, %cst_26 [1] : vector<16x10xf32> to vector<16xf32>
    %35 = vector.shape_cast %34 : vector<16xf32> to vector<16x1xf32>
    %c0_27 = arith.constant 0 : index
    %c0_28 = arith.constant 0 : index
    %36 = vector.load %arg6[%c0_27, %c0_28] : memref<1x10xf32, #tpu.memory_space<vmem>>, vector<1x10xf32>
    %37 = vector.broadcast %36 : vector<1x10xf32> to vector<16x10xf32>
    %38 = arith.mulf %24, %37 : vector<16x10xf32>
    %cst_29 = arith.constant 1.000000e+00 : f32
    %39 = vector.broadcast %cst_29 : f32 to vector<16x10xf32>
    %40 = arith.subf %39, %24 : vector<16x10xf32>
    %c0_30 = arith.constant 0 : index
    %c0_31 = arith.constant 0 : index
    %41 = vector.load %arg7[%c0_30, %c0_31] : memref<1x10xf32, #tpu.memory_space<vmem>>, vector<1x10xf32>
    %42 = vector.broadcast %41 : vector<1x10xf32> to vector<16x10xf32>
    %43 = arith.mulf %40, %42 : vector<16x10xf32>
    %44 = arith.addf %38, %43 : vector<16x10xf32>
    %cst_32 = arith.constant dense<0.000000e+00> : vector<16xf32>
    %45 = vector.multi_reduction <add>, %44, %cst_32 [1] : vector<16x10xf32> to vector<16xf32>
    %46 = vector.shape_cast %45 : vector<16xf32> to vector<16x1xf32>
    %47 = arith.subf %35, %46 : vector<16x1xf32>
    %c0_33 = arith.constant 0 : index
    %c0_34 = arith.constant 0 : index
    %48 = vector.load %arg14[%c0_33, %c0_34] : memref<16x1xf32, #tpu.memory_space<vmem>>, vector<16x1xf32>
    tpu.vector_store %arg14[%c0_33, %c0_34], %47 {strides = array<i32>} : memref<16x1xf32, #tpu.memory_space<vmem>>, vector<16x1xf32>,
    return
  }
  func.func @transform_0(%arg0: i32) -> (i32, i32) {
    %c0_i32 = arith.constant 0 : i32
    %c0_i32_0 = arith.constant 0 : i32
    return %arg0, %c0_i32 : i32, i32
  }
  func.func @transform_1(%arg0: i32) -> (i32, i32) {
    %c0_i32 = arith.constant 0 : i32
    %c0_i32_0 = arith.constant 0 : i32
    return %arg0, %c0_i32 : i32, i32
  }
  func.func @transform_2(%arg0: i32) -> (i32, i32) {
    %c0_i32 = arith.constant 0 : i32
    %c0_i32_0 = arith.constant 0 : i32
    return %arg0, %c0_i32 : i32, i32
  }
  func.func @transform_3(%arg0: i32) -> (i32, i32) {
    %c0_i32 = arith.constant 0 : i32
    %c0_i32_0 = arith.constant 0 : i32
    return %arg0, %c0_i32 : i32, i32
  }
  func.func @transform_4(%arg0: i32) -> (i32, i32) {
    %c0_i32 = arith.constant 0 : i32
    %c0_i32_0 = arith.constant 0 : i32
    return %arg0, %c0_i32 : i32, i32
  }
  func.func @transform_5(%arg0: i32) -> (i32, i32) {
    %c0_i32 = arith.constant 0 : i32
    %c0_i32_0 = arith.constant 0 : i32
    %c0_i32_1 = arith.constant 0 : i32
    return %c0_i32, %c0_i32_0 : i32, i32
  }
  func.func @transform_6(%arg0: i32) -> (i32, i32) {
    %c0_i32 = arith.constant 0 : i32
    %c0_i32_0 = arith.constant 0 : i32
    %c0_i32_1 = arith.constant 0 : i32
    return %c0_i32, %c0_i32_0 : i32, i32
  }
  func.func @transform_7(%arg0: i32) -> (i32, i32) {
    %c0_i32 = arith.constant 0 : i32
    %c0_i32_0 = arith.constant 0 : i32
    %c0_i32_1 = arith.constant 0 : i32
    return %c0_i32, %c0_i32_0 : i32, i32
  }
  func.func @transform_8(%arg0: i32) -> (i32, i32) {
    %c0_i32 = arith.constant 0 : i32
    %c0_i32_0 = arith.constant 0 : i32
    %c0_i32_1 = arith.constant 0 : i32
    return %c0_i32, %c0_i32_0 : i32, i32
  }
  func.func @transform_9(%arg0: i32) -> (i32, i32) {
    %c0_i32 = arith.constant 0 : i32
    %c0_i32_0 = arith.constant 0 : i32
    %c0_i32_1 = arith.constant 0 : i32
    return %c0_i32, %c0_i32_0 : i32, i32
  }
  func.func @transform_10(%arg0: i32) -> (i32, i32) {
    %c0_i32 = arith.constant 0 : i32
    %c0_i32_0 = arith.constant 0 : i32
    %c0_i32_1 = arith.constant 0 : i32
    return %c0_i32, %c0_i32_0 : i32, i32
  }
  func.func @transform_11(%arg0: i32) -> (i32, i32) {
    %c0_i32 = arith.constant 0 : i32
    %c0_i32_0 = arith.constant 0 : i32
    %c0_i32_1 = arith.constant 0 : i32
    return %c0_i32, %c0_i32_0 : i32, i32
  }
  func.func @transform_12(%arg0: i32) -> (i32, i32) {
    %c0_i32 = arith.constant 0 : i32
    %c0_i32_0 = arith.constant 0 : i32
    return %arg0, %c0_i32 : i32, i32
  }
  func.func @transform_13(%arg0: i32) -> (i32, i32) {
    %c0_i32 = arith.constant 0 : i32
    %c0_i32_0 = arith.constant 0 : i32
    return %arg0, %c0_i32 : i32, i32
  }
}

</mosaic_0001>

<bundles_post_ra>
// kernel: tpu_custom_call.1
= control target key start
LH: loop header
LB: loop body
LE: loop exit
PB: predicated region body
PF: predicated region fallthrough
CT: control target
= control target key end

     0   :  { %s1682_s25 = smov 0   ;;  %s2009_s0 = inlined_call_operand.vmem [shape: f32[200,6], index: 0, kind: input, shape index: {}]   ;;  %s2010_s1 = inlined_call_operand.vmem [shape: f32[200,4], index: 1, kind: input, shape index: {}]   ;;  %s2011_s2 = inlined_call_operand.vmem [shape: f32[200,1], index: 2, kind: input, shape index: {}]   ;;  %s2012_s3 = inlined_call_operand.vmem [shape: f32[20,10], index: 3, kind: input, shape index: {}]   ;;  %s2013_s4 = inlined_call_operand.vmem [shape: f32[20,10], index: 4, kind: input, shape index: {}]   ;;  %s2014_s5 = inlined_call_operand.vmem [shape: f32[1,10], index: 5, kind: input, shape index: {}]   ;;  %s2015_s6 = inlined_call_operand.vmem [shape: f32[1,10], index: 6, kind: input, shape index: {}]   ;;  %s2016_s7 = inlined_call_operand.vmem [shape: f32[6,32], index: 7, kind: input, shape index: {}]   ;;  %s2017_s8 = inlined_call_operand.vmem [shape: f32[4,32], index: 8, kind: input, shape index: {}]   ;;  %s2018_s9 = inlined_call_operand.vmem [shape: f32[1,32], index: 9, kind: input, shape index: {}]   ;;  %s2019_s10 = inlined_call_operand.vmem [shape: f32[1,32], index: 10, kind: input, shape index: {}]   ;;  %s2020_s11 = inlined_call_operand.vmem [shape: f32[1,32], index: 11, kind: input, shape index: {}]   ;;  %s2021_s12 = inlined_call_operand.vmem [shape: f32[320,1], index: 12, kind: output, shape index: {0}]   ;;  %s2022_s13 = inlined_call_operand.vmem [shape: f32[32,1], index: 13, kind: output, shape index: {1}]  }
   0x1 LB: > { %s1477_s26 = sadd.s32 4294967295, %s1609_s25   ;;  %p1481_p0 = scmp.ge.s32.totalorder %s1609_s25, 1  ;;  %s1609_s25 = sphi %s1682_s25, %s24_s25  }
   0x2   : > { %p475_p1 = scmp.lt.s32.totalorder %s1609_s25, 3 }
   0x4   : > { %p476_p2 = pnand %p1481_p0, %p475_p1 }
   0x5   : > { %s1698_s14 = smul.u32 (!%p476_p2), 20, %s1477_s26  ;;  %s1797_s28 = sshll.u32 (!%p476_p2), %s1477_s26, 1 }
   0x6   : > { %479 = sbr.rel (%p476_p2) target bundleno = 357 (0x165), region = 68  ;;  %p611_p4 = scmp.lt.s32.totalorder (!%p476_p2), %s1797_s28, 2 }
   0x7   : > { %p569_p3 = scmp.lt.s32.totalorder (!%p476_p2), %s1698_s14, 24  ;;  %p641_p5 = scmp.lt.s32.totalorder (!%p476_p2), %s1797_s28, 3 }
   0x8   : > { %p635_p6 = scmp.lt.s32.totalorder (!%p476_p2), %s1698_s14, 39 }
   0xb   : > { %v687_v0 = vld [vmem:[%s2017_s8] sm:$0xf]  ;;  %vm749_vm0 = vcmask 1043456   ;;  %v1611_v2 = vmov 0   ;;  %vm891_vm1 = vcmask 1045504   ;;  %s570_s15 = scalar_select %p569_p3, %s1698_s14, 24 }
   0xc   : > { %v666_v1 = vld [vmem:[%s2016_s7] sm:$0x3f]  ;;  %1548 = vset.pattern.permute.xlu1 %v1611_v2  ;;  %1547 = vset.pattern.permute.xlu0 %v1611_v2  ;;  %vm688_vm2 = vcmask 31744   ;;  %vm830_vm3 = vcmask 48128   ;;  %s612_s29 = scalar_select %p611_p4, %s1797_s28, 2  ;;  %vm1306_vm5 = vcmask 80896  }
   0xd   : > { %1492 = vmatpush.msk.msra.mxu0 %vm749_vm0, %v687_v0  ;;  %1536 = vmatpush.msk.msra.mxu2 %vm749_vm0, %v687_v0  ;;  %s1482_s16 = sshll.u32 %s570_s15, 3  ;;  %vm1204_vm7 = vcmask 261120   ;;  %s2024_s28 = smov (!%p641_p5, %s1797_s28), 3  ;;  %vm1265_vm8 = vcmask 7168  }
   0xe   : > { %1513 = vmatpush.msk.msra.mxu1 %vm891_vm1, %v666_v1  ;;  %1537 = vmatpush.msk.msra.mxu3 %vm891_vm1, %v666_v1  ;;  %s1705_s19 = scalar_lea.vmem %s2011_s2, %s1482_s16  ;;  %s1710_s22 = scalar_lea.vmem %s2010_s1, %s1482_s16 }
   0xf   : > { %1549 = vset.pattern.permute.xlu2 %v1611_v2  ;;  %v974_v3 = vld [vmem:[%s1705_s19 + $0x10] sm:$0xff]  ;;  %v972_v4 = vld [vmem:[%s1705_s19] sm:$0xff]  ;;  %s1718_s27 = scalar_lea.vmem %s2009_s0, %s1482_s16  ;;  %v975_v10 = vld [vmem:[%s1705_s19 + $0x18] sm:$0xff]  ;;  %s1486_s26 = sshll.u32 %s612_s29, 3 }
  0x10   : > { %v667_v5 = vld [vmem:[%s1710_s22] sm:$0xff]  ;;  %1005 = vperm.xlu1 %1548, %v974_v3   ;;  %995 = vperm.xlu0 %1547, %v972_v4   ;;  %v677_v6 = vld [vmem:[%s1710_s22 + $0x50] sm:$0xff]  ;;  %v973_v11 = vld [vmem:[%s1705_s19 + $0x8] sm:$0xff]  ;;  %s614_s16 = scalar_lea.vmem %s2012_s3, %s1486_s26  ;;  %s2026_s14 = smov (!%p635_p6, %s1698_s14), 39 }
  0x11   : > { %v646_v7 = vld [vmem:[%s1718_s27] sm:$0xff]  ;;  %v656_v8 = vld [vmem:[%s1718_s27 + $0x50] sm:$0xff]  ;;  %1493 = vmatmul.msk.f32.vlgmr.msra.gmra.mxu0 %vm688_vm2, %v667_v5  ;;  %1503 = vmatmul.msk.f32.vlgmr.msra.gmra.mxu2 %vm688_vm2, %v677_v6  ;;  %v668_v12 = vld [vmem:[%s1710_s22 + $0x8] sm:$0xff]  ;;  %s1489_s20 = sshll.u32 %s2026_s14, 3 }
  0x12   : > { %1514 = vmatmul.msk.f32.vlgmr.msra.gmra.mxu1 %vm830_vm3, %v646_v7  ;;  %1524 = vmatmul.msk.f32.vlgmr.msra.gmra.mxu3 %vm830_vm3, %v656_v8  ;;  %v976_v9 = vld [vmem:[%s1705_s19 + $0x20] sm:$0xff]  ;;  %v678_v13 = vld [vmem:[%s1710_s22 + $0x58] sm:$0xff]  ;;  %v647_v14 = vld [vmem:[%s1718_s27 + $0x8] sm:$0xff] }
  0x13   : > { %1015 = vperm.xlu2 %1549, %v976_v9   ;;  %v657_v15 = vld [vmem:[%s1718_s27 + $0x58] sm:$0xff]  ;;  %v977_v16 = vld [vmem:[%s1705_s19 + $0x28] sm:$0xff]  ;;  %v978_v18 = vld [vmem:[%s1705_s19 + $0x30] sm:$0xff] }
  0x14   : > { %v979_v17 = vld [vmem:[%s1705_s19 + $0x38] sm:$0xff]  ;;  %v669_v19 = vld [vmem:[%s1710_s22 + $0x10] sm:$0xff]  ;;  %v679_v20 = vld [vmem:[%s1710_s22 + $0x60] sm:$0xff] }
  0x15   : > { %v648_v21 = vld [vmem:[%s1718_s27 + $0x10] sm:$0xff]  ;;  %v658_v22 = vld [vmem:[%s1718_s27 + $0x60] sm:$0xff]  ;;  %v981_v25 = vld [vmem:[%s1705_s19 + $0x48] sm:$0xff] }
  0x16   : > { %v980_v23 = vld [vmem:[%s1705_s19 + $0x40] sm:$0xff]  ;;  %v982_v24 = vld [vmem:[%s1705_s19 + $0x50] sm:$0xff]  ;;  %v670_v26 = vld [vmem:[%s1710_s22 + $0x18] sm:$0xff] }
  0x17   : > { %v680_v27 = vld [vmem:[%s1710_s22 + $0x68] sm:$0xff]  ;;  %v649_v28 = vld [vmem:[%s1718_s27 + $0x18] sm:$0xff]  ;;  %v984_v32 = vld [vmem:[%s1705_s19 + $0x60] sm:$0xff] }
  0x18   : > { %1010 = vperm.xlu1 %1548, %v975_v10   ;;  %1000 = vperm.xlu0 %1547, %v973_v11   ;;  %v659_v29 = vld [vmem:[%s1718_s27 + $0x68] sm:$0xff]  ;;  %v983_v30 = vld [vmem:[%s1705_s19 + $0x58] sm:$0xff]  ;;  %v671_v33 = vld [vmem:[%s1710_s22 + $0x20] sm:$0xff] }
  0x19   : > { %1494 = vmatmul.msk.f32.gmra.mxu0 %vm688_vm2, %v668_v12  ;;  %1504 = vmatmul.msk.f32.gmra.mxu2 %vm688_vm2, %v678_v13  ;;  %v985_v31 = vld [vmem:[%s1705_s19 + $0x68] sm:$0xff]  ;;  %v681_v34 = vld [vmem:[%s1710_s22 + $0x70] sm:$0xff]  ;;  %v650_v35 = vld [vmem:[%s1718_s27 + $0x20] sm:$0xff] }
  0x1a   : > { %1515 = vmatmul.msk.f32.gmra.mxu1 %vm830_vm3, %v647_v14  ;;  %1525 = vmatmul.msk.f32.gmra.mxu3 %vm830_vm3, %v657_v15  ;;  %v660_v36 = vld [vmem:[%s1718_s27 + $0x70] sm:$0xff]  ;;  %v988_v38 = vld [vmem:[%s1705_s19 + $0x80] sm:$0xff]  ;;  %v987_v39 = vld [vmem:[%s1705_s19 + $0x78] sm:$0xff] }
  0x1b   : > { %1020 = vperm.xlu2 %1549, %v977_v16   ;;  %v986_v37 = vld [vmem:[%s1705_s19 + $0x70] sm:$0xff]  ;;  %v672_v40 = vld [vmem:[%s1710_s22 + $0x28] sm:$0xff]  ;;  %v682_v41 = vld [vmem:[%s1710_s22 + $0x78] sm:$0xff] }
  0x1c   : > { %v651_v42 = vld [vmem:[%s1718_s27 + $0x28] sm:$0xff]  ;;  %v661_v43 = vld [vmem:[%s1718_s27 + $0x78] sm:$0xff]  ;;  %v990_v46 = vld [vmem:[%s1705_s19 + $0x90] sm:$0xff] }
  0x1d   : > { %v989_v44 = vld [vmem:[%s1705_s19 + $0x88] sm:$0xff]  ;;  %v991_v45 = vld [vmem:[%s1705_s19 + $0x98] sm:$0xff]  ;;  %v673_v47 = vld [vmem:[%s1710_s22 + $0x30] sm:$0xff]  ;;  %s628_s19 = scalar_lea.vmem %s2013_s4, %s1486_s26 }
  0x1e   : > { %v683_v48 = vld [vmem:[%s1710_s22 + $0x80] sm:$0xff]  ;;  %v652_v49 = vld [vmem:[%s1718_s27 + $0x30] sm:$0xff]  ;;  %v674_v51 = vld [vmem:[%s1710_s22 + $0x38] sm:$0xff] }
  0x1f   : > { %v662_v50 = vld [vmem:[%s1718_s27 + $0x80] sm:$0xff]  ;;  %v684_v52 = vld [vmem:[%s1710_s22 + $0x88] sm:$0xff]  ;;  %v653_v53 = vld [vmem:[%s1718_s27 + $0x38] sm:$0xff] }
  0x20   : > { %1030 = vperm.xlu1 %1548, %v979_v17   ;;  %1025 = vperm.xlu0 %1547, %v978_v18   ;;  %v663_v54 = vld [vmem:[%s1718_s27 + $0x88] sm:$0xff]  ;;  %v675_v55 = vld [vmem:[%s1710_s22 + $0x40] sm:$0xff]  ;;  %v685_v56 = vld [vmem:[%s1710_s22 + $0x90] sm:$0xff] }
  0x21   : > { %1495 = vmatmul.msk.f32.gmra.mxu0 %vm688_vm2, %v669_v19  ;;  %1505 = vmatmul.msk.f32.gmra.mxu2 %vm688_vm2, %v679_v20  ;;  %v654_v57 = vld [vmem:[%s1718_s27 + $0x40] sm:$0xff]  ;;  %v664_v58 = vld [vmem:[%s1718_s27 + $0x90] sm:$0xff]  ;;  %v676_v59 = vld [vmem:[%s1710_s22 + $0x48] sm:$0xff] }
  0x22   : > { %1516 = vmatmul.msk.f32.gmra.mxu1 %vm830_vm3, %v648_v21  ;;  %1526 = vmatmul.msk.f32.gmra.mxu3 %vm830_vm3, %v658_v22  ;;  %v686_v60 = vld [vmem:[%s1710_s22 + $0x98] sm:$0xff]  ;;  %v655_v61 = vld [vmem:[%s1718_s27 + $0x48] sm:$0xff]  ;;  %v1286_v63 = vld [vmem:[%s614_s16] sm:$0xff] }
  0x23   : > { %1035 = vperm.xlu2 %1549, %v980_v23   ;;  %v665_v62 = vld [vmem:[%s1718_s27 + $0x98] sm:$0xff]  ;;  %v1292_v0 = vmul.f32 1.442695, %v1286_v63  ;;  %v1288_v5 = vld [vmem:[%s628_s19] sm:$0xff]  ;;  %v1287_v7 = vld [vmem:[%s614_s16 + $0x8] sm:$0xff]  ;;  %s1491_s16 = sshll.u32 %s2024_s28, 3  ;;  %s1964_s28 = scalar_lea.vmem %s2021_s12, %s1489_s20 }
  0x24   : > { %vm1290_vm4 = vcmp.gt.f32.partialorder %v1288_v5, 0.0  ;;  %v1294_v9 = vmul.f32 1.442695, %v1287_v7  ;;  %v1289_v11 = vld [vmem:[%s628_s19 + $0x8] sm:$0xff]  ;;  %v1552_v12 = vld [vmem:[%s2014_s5] ss:$0 sm:$0xff]  ;;  %s644_s19 = scalar_lea.vmem %s2022_s13, %s1491_s16 }
  0x25   : > { %1555 = vpow2.f32 %v1292_v0  ;;  %v1320_v13 = vsub.f32 1.0, %v1289_v11  ;;  %v1553_v14 = vld [vmem:[%s2015_s6] ss:$0 sm:$0xff]  ;;  %v1318_v15 = vmul.f32 %v1552_v12, %v1289_v11  ;;  %v1319_v23 = vsub.f32 1.0, %v1288_v5 }
  0x26   : > { %vm1291_vm6 = vcmp.gt.f32.partialorder %v1289_v11, 0.0 }
  0x27   : > { %v1326_v16 = vmul.f32 %v1553_v14, %v1320_v13 }
  0x28   : > { %1045 = vperm.xlu1 %1548, %v982_v24   ;;  %1040 = vperm.xlu0 %1547, %v981_v25   ;;  %v1317_v24 = vmul.f32 %v1552_v12, %v1288_v5  ;;  %v1325_v25 = vmul.f32 %v1553_v14, %v1319_v23 }
  0x29   : > { %1496 = vmatmul.msk.f32.gmra.mxu0 %vm688_vm2, %v670_v26  ;;  %1506 = vmatmul.msk.f32.gmra.mxu2 %vm688_vm2, %v680_v27  ;;  %v1328_v17 = vadd.f32 %v1326_v16, %v1318_v15 }
  0x2a   : > { %1517 = vmatmul.msk.f32.gmra.mxu1 %vm830_vm3, %v649_v28  ;;  %1527 = vmatmul.msk.f32.gmra.mxu3 %vm830_vm3, %v659_v29  ;;  %v1327_v29 = vadd.f32 %v1325_v25, %v1317_v24 }
  0x2b   : > { %1050 = vperm.xlu2 %1549, %v983_v30   ;;  %v1556_v1 = vpop.eup %1555  ;;  %v1332_v19 = vsel %vm1306_vm5, %v1328_v17, 0.0 }
  0x2c   : > { %v1296_v2 = vsub.f32 1.0, %v1556_v1 }
  0x2e   : > { %v1298_v3 = vadd.f32 1e-07, %v1296_v2 }
  0x30   : > { %1060 = vperm.xlu1 %1548, %v985_v31   ;;  %1055 = vperm.xlu0 %1547, %v984_v32   ;;  %1557 = vlog2.f32 %v1298_v3  ;;  %v1329_v31 = vsel %vm1306_vm5, %v1327_v29, 0.0 }
  0x31   : > { %1497 = vmatmul.msk.f32.gmra.mxu0 %vm688_vm2, %v671_v33  ;;  %1507 = vmatmul.msk.f32.gmra.mxu2 %vm688_vm2, %v681_v34  ;;  %1559 = vpow2.f32 %v1294_v9 }
  0x32   : > { %1518 = vmatmul.msk.f32.gmra.mxu1 %vm830_vm3, %v650_v35  ;;  %1528 = vmatmul.msk.f32.gmra.mxu3 %vm830_vm3, %v660_v36  ;;  %v1846_v35 = vld [vmem:[%s2018_s9] ss:$0 sm:$0xff] }
  0x33   : > { %1065 = vperm.xlu2 %1549, %v986_v37  }
  0x36   : > { %v1558_v4 = vpop.eup %1557 }
  0x37   : > { %v1301_v6 = vmul.f32 0.6931472, %v1558_v4  ;;  %v1560_v18 = vpop.eup %1559 }
  0x38   : > { %1075 = vperm.xlu1 %1548, %v988_v38   ;;  %1070 = vperm.xlu0 %1547, %v987_v39   ;;  %v1297_v20 = vsub.f32 1.0, %v1560_v18 }
  0x39   : > { %1498 = vmatmul.msk.f32.gmra.mxu0 %vm688_vm2, %v672_v40  ;;  %1508 = vmatmul.msk.f32.gmra.mxu2 %vm688_vm2, %v682_v41  ;;  %v1304_v8 = vsel %vm1290_vm4, %v1286_v63, %v1301_v6 }
  0x3a   : > { %1519 = vmatmul.msk.f32.gmra.mxu1 %vm830_vm3, %v651_v42  ;;  %1529 = vmatmul.msk.f32.gmra.mxu3 %vm830_vm3, %v661_v43  ;;  %v1307_v10 = vsel %vm1306_vm5, %v1304_v8, 0.0  ;;  %v1299_v21 = vadd.f32 1e-07, %v1297_v20  ;;  %v1852_v42 = vld [vmem:[%s2019_s10] ss:$0 sm:$0xff] }
  0x3b   : > { %1080 = vperm.xlu2 %1549, %v989_v44  }
  0x3c   : > { %1561 = vlog2.f32 %v1299_v21 }
  0x40   : > { %1090 = vperm.xlu1 %1548, %v991_v45   ;;  %1085 = vperm.xlu0 %1547, %v990_v46  }
  0x41   : > { %1499 = vmatmul.msk.f32.gmra.mxu0 %vm688_vm2, %v673_v47  ;;  %1509 = vmatmul.msk.f32.gmra.mxu2 %vm688_vm2, %v683_v48 }
  0x42   : > { %1520 = vmatmul.msk.f32.gmra.mxu1 %vm830_vm3, %v652_v49  ;;  %1530 = vmatmul.msk.f32.gmra.mxu3 %vm830_vm3, %v662_v50  ;;  %v1562_v26 = vpop.eup %1561 }
  0x43   : > { %v1303_v30 = vmul.f32 0.6931472, %v1562_v26 }
  0x45   : > { %v1305_v32 = vsel %vm1291_vm6, %v1287_v7, %v1303_v30 }
  0x46   : > { %v1310_v33 = vsel %vm1306_vm5, %v1305_v32, 0.0 }
  0x49   : > { %1500 = vmatmul.msk.f32.gmra.mxu0 %vm688_vm2, %v674_v51  ;;  %1510 = vmatmul.msk.f32.gmra.mxu2 %vm688_vm2, %v684_v52 }
  0x4a   : > { %1521 = vmatmul.msk.f32.gmra.mxu1 %vm830_vm3, %v653_v53  ;;  %1531 = vmatmul.msk.f32.gmra.mxu3 %vm830_vm3, %v663_v54  ;;  %v1865_v54 = vld [vmem:[%s2020_s11] ss:$0 sm:$0xff] }
  0x51   : > { %1501 = vmatmul.msk.f32.gmra.mxu0 %vm688_vm2, %v675_v55  ;;  %1511 = vmatmul.msk.f32.gmra.mxu2 %vm688_vm2, %v685_v56 }
  0x52   : > { %1522 = vmatmul.msk.f32.gmra.mxu1 %vm830_vm3, %v654_v57  ;;  %1532 = vmatmul.msk.f32.gmra.mxu3 %vm830_vm3, %v664_v58 }
  0x59   : > { %1502 = vmatmul.msk.f32.gmra.mxu0 %vm688_vm2, %v676_v59  ;;  %1512 = vmatmul.msk.f32.gmra.mxu2 %vm688_vm2, %v686_v60 }
  0x5a   : > { %1523 = vmatmul.msk.f32.gmra.mxu1 %vm830_vm3, %v655_v61  ;;  %1533 = vmatmul.msk.f32.gmra.mxu3 %vm830_vm3, %v665_v62 }
  0x64   : > { %1308 = vadd.xlane.f32.xlu2 %v1307_v10 }
  0x6a   : > { %1330 = vadd.xlane.f32.xlu0 %v1329_v31  ;;  %1311 = vadd.xlane.f32.xlu1 %v1310_v33 }
  0x6c   : > { %1333 = vadd.xlane.f32.xlu2 %v1332_v19 }
  0x6d   : > { %v1837_v22 = vpop.permute.xlu2 %1015 }
  0x75   : > { %v1841_v34 = vpop.permute.xlu2 %1020 }
  0x7d   : > { %v1854_v43 = vpop.permute.xlu2 %1035 }
  0x82   : > { %v1006_v27 = vpop.permute.xlu1 %1005  ;;  %v996_v28 = vpop.permute.xlu0 %995 }
  0x83   : > { %v1096_v38 = vmul.f32 %v1846_v35, %v996_v28  ;;  %v1098_v8 = vmul.f32 %v1846_v35, %v1006_v27 }
  0x85   : > { %v1051_v57 = vpop.permute.xlu2 %1050 }
  0x86   : > { %v1107_v61 = vmul.f32 %v1846_v35, %v1051_v57 }
  0x8a   : > { %v1011_v36 = vpop.permute.xlu1 %1010  ;;  %v1001_v37 = vpop.permute.xlu0 %1000 }
  0x8b   : > { %v1097_v52 = vmul.f32 %v1846_v35, %v1001_v37  ;;  %v1099_v23 = vmul.f32 %v1846_v35, %v1011_v36 }
  0x8e   : > { %v770_v39 = vpop.f32.mrf.mxu0 }
  0x8f   : > { %v912_v40 = vpop.f32.mrf.mxu1 }
  0x90   : > { %v913_v41 = vadd.f32 %v912_v40, %v770_v39 }
  0x92   : > { %v1116_v44 = vadd.f32 %v1096_v38, %v913_v41  ;;  %v1856_v45 = vpop.permute.xlu1 %1030  ;;  %v1858_v46 = vpop.permute.xlu0 %1025 }
  0x94   : > { %v1140_v47 = vadd.f32 %v1852_v42, %v1116_v44  ;;  %v800_v48 = vpop.f32.mrf.mxu2 }
  0x95   : > { %v942_v49 = vpop.f32.mrf.mxu3 }
  0x96   : > { %1563 = vtanh.f32 %v1140_v47  ;;  %v773_v50 = vpop.f32.mrf.mxu0  ;;  %v943_v58 = vadd.f32 %v942_v49, %v800_v48 }
  0x97   : > { %v915_v51 = vpop.f32.mrf.mxu1 }
  0x98   : > { %v916_v53 = vadd.f32 %v915_v51, %v773_v50  ;;  %v1100_v51 = vmul.f32 %v1846_v35, %v1837_v22 }
  0x9a   : > { %v1046_v55 = vpop.permute.xlu1 %1045  ;;  %v1867_v56 = vpop.permute.xlu0 %1040  ;;  %v1117_v63 = vadd.f32 %v1097_v52, %v916_v53 }
  0x9b   : > { %v1106_v59 = vmul.f32 %v1846_v35, %v1046_v55 }
  0x9c   : > { %v1564_v60 = vpop.eup %1563  ;;  %v803_v62 = vpop.f32.mrf.mxu2  ;;  %v1141_v11 = vadd.f32 %v1852_v42, %v1117_v63 }
  0x9d   : > { %v1126_v0 = vadd.f32 %v1106_v59, %v943_v58  ;;  %v945_v1 = vpop.f32.mrf.mxu3  ;;  %v1184_v2 = vmul.f32 %v1564_v60, %v1865_v54 }
  0x9e   : > { %v946_v3 = vadd.f32 %v945_v1, %v803_v62  ;;  %v776_v4 = vpop.f32.mrf.mxu0 }
  0x9f   : > { %v1150_v5 = vadd.f32 %v1852_v42, %v1126_v0  ;;  %v918_v6 = vpop.f32.mrf.mxu1  ;;  %v1205_v7 = vsel %vm1204_vm7, %v1184_v2, 0.0  ;;  %v1066_v0 = vpop.permute.xlu2 %1065 }
  0xa0   : > { %v1127_v9 = vadd.f32 %v1107_v61, %v946_v3  ;;  %v919_v10 = vadd.f32 %v918_v6, %v776_v4  ;;  %1206 = vadd.xlane.f32.xlu2 %v1205_v7  ;;  %v1110_v4 = vmul.f32 %v1846_v35, %v1066_v0 }
  0xa1   : > { %1565 = vtanh.f32 %v1150_v5 }
  0xa2   : > { %v1151_v12 = vadd.f32 %v1852_v42, %v1127_v9  ;;  %v1118_v13 = vadd.f32 %v1098_v8, %v919_v10  ;;  %v1056_v14 = vpop.permute.xlu0 %1055  ;;  %v1061_v33 = vpop.permute.xlu1 %1060  ;;  %v1101_v8 = vmul.f32 %v1846_v35, %v1841_v34 }
  0xa3   : > { %v1108_v16 = vmul.f32 %v1846_v35, %v1056_v14  ;;  %v1109_v44 = vmul.f32 %v1846_v35, %v1061_v33 }
  0xa4   : > { %1567 = vtanh.f32 %v1151_v12  ;;  %v1142_v15 = vadd.f32 %v1852_v42, %v1118_v13  ;;  %v806_v17 = vpop.f32.mrf.mxu2 }
  0xa5   : > { %1569 = vtanh.f32 %v1141_v11  ;;  %v948_v18 = vpop.f32.mrf.mxu3 }
  0xa6   : > { %v949_v19 = vadd.f32 %v948_v18, %v806_v17  ;;  %v779_v20 = vpop.f32.mrf.mxu0  ;;  %1571 = vtanh.f32 %v1142_v15 }
  0xa7   : > { %v1566_v21 = vpop.eup %1565  ;;  %v921_v24 = vpop.f32.mrf.mxu1 }
  0xa8   : > { %v1128_v25 = vadd.f32 %v1108_v16, %v949_v19  ;;  %v922_v26 = vadd.f32 %v921_v24, %v779_v20  ;;  %v1194_v27 = vmul.f32 %v1566_v21, %v1865_v54 }
  0xaa   : > { %v1568_v28 = vpop.eup %1567  ;;  %v1152_v29 = vadd.f32 %v1852_v42, %v1128_v25  ;;  %v1119_v30 = vadd.f32 %v1099_v23, %v922_v26  ;;  %v1235_v31 = vsel %vm1204_vm7, %v1194_v27, 0.0  ;;  %v1071_v15 = vpop.permute.xlu0 %1070  ;;  %v1102_v27 = vmul.f32 %v1846_v35, %v1858_v46 }
  0xab   : > { %v1570_v32 = vpop.eup %1569  ;;  %1236 = vadd.xlane.f32.xlu0 %v1235_v31  ;;  %v1195_v37 = vmul.f32 %v1568_v28, %v1865_v54  ;;  %v1111_v23 = vmul.f32 %v1846_v35, %v1071_v15 }
  0xac   : > { %1573 = vtanh.f32 %v1152_v29  ;;  %v1143_v36 = vadd.f32 %v1852_v42, %v1119_v30  ;;  %v809_v38 = vpop.f32.mrf.mxu2  ;;  %v1572_v41 = vpop.eup %1571  ;;  %v1185_v49 = vmul.f32 %v1570_v32, %v1865_v54 }
  0xad   : > { %v951_v39 = vpop.f32.mrf.mxu3  ;;  %v1238_v40 = vsel %vm1204_vm7, %v1195_v37, 0.0  ;;  %v1186_v55 = vmul.f32 %v1572_v41, %v1865_v54  ;;  %v1076_v37 = vpop.permute.xlu1 %1075 }
  0xae   : > { %v952_v47 = vadd.f32 %v951_v39, %v809_v38  ;;  %1239 = vadd.xlane.f32.xlu1 %v1238_v40  ;;  %v782_v48 = vpop.f32.mrf.mxu0  ;;  %1575 = vtanh.f32 %v1143_v36  ;;  %v1208_v60 = vsel %vm1204_vm7, %v1185_v49, 0.0 }
  0xaf   : > { %v924_v50 = vpop.f32.mrf.mxu1  ;;  %v1211_v1 = vsel %vm1204_vm7, %v1186_v55, 0.0 }
  0xb0   : > { %v1129_v52 = vadd.f32 %v1109_v44, %v952_v47  ;;  %v925_v53 = vadd.f32 %v924_v50, %v782_v48  ;;  %v1112_v48 = vmul.f32 %v1846_v35, %v1076_v37 }
  0xb2   : > { %v1574_v57 = vpop.eup %1573  ;;  %v1153_v58 = vadd.f32 %v1852_v42, %v1129_v52  ;;  %v1120_v59 = vadd.f32 %v1100_v51, %v925_v53  ;;  %v1103_v53 = vmul.f32 %v1846_v35, %v1856_v45 }
  0xb3   : > { %1209 = vadd.xlane.f32.xlu0 %v1208_v60  ;;  %v1196_v61 = vmul.f32 %v1574_v57, %v1865_v54 }
  0xb4   : > { %1577 = vtanh.f32 %v1153_v58  ;;  %v1144_v62 = vadd.f32 %v1852_v42, %v1120_v59  ;;  %v812_v63 = vpop.f32.mrf.mxu2  ;;  %v1576_v3 = vpop.eup %1575 }
  0xb5   : > { %v954_v22 = vpop.f32.mrf.mxu3  ;;  %v1241_v2 = vsel %vm1204_vm7, %v1196_v61, 0.0  ;;  %v1187_v11 = vmul.f32 %v1576_v3, %v1865_v54 }
  0xb6   : > { %v955_v5 = vadd.f32 %v954_v22, %v812_v63  ;;  %1212 = vadd.xlane.f32.xlu1 %v1211_v1  ;;  %1242 = vadd.xlane.f32.xlu2 %v1241_v2  ;;  %v785_v6 = vpop.f32.mrf.mxu0  ;;  %1579 = vtanh.f32 %v1144_v62 }
  0xb7   : > { %v927_v7 = vpop.f32.mrf.mxu1  ;;  %v1214_v34 = vsel %vm1204_vm7, %v1187_v11, 0.0 }
  0xb8   : > { %v1130_v9 = vadd.f32 %v1110_v4, %v955_v5  ;;  %v928_v10 = vadd.f32 %v927_v7, %v785_v6  ;;  %v1104_v5 = vmul.f32 %v1846_v35, %v1854_v43 }
  0xba   : > { %v1578_v12 = vpop.eup %1577  ;;  %v1154_v13 = vadd.f32 %v1852_v42, %v1130_v9  ;;  %v1121_v14 = vadd.f32 %v1101_v8, %v928_v10  ;;  %v1086_v9 = vpop.permute.xlu0 %1085 }
  0xbb   : > { %v1197_v16 = vmul.f32 %v1578_v12, %v1865_v54 }
  0xbc   : > { %1581 = vtanh.f32 %v1154_v13  ;;  %v1145_v17 = vadd.f32 %v1852_v42, %v1121_v14  ;;  %v815_v18 = vpop.f32.mrf.mxu2  ;;  %v1580_v21 = vpop.eup %1579 }
  0xbd   : > { %v957_v19 = vpop.f32.mrf.mxu3  ;;  %v1244_v20 = vsel %vm1204_vm7, %v1197_v16, 0.0  ;;  %v1188_v30 = vmul.f32 %v1580_v21, %v1865_v54  ;;  %v1081_v14 = vpop.permute.xlu2 %1080 }
  0xbe   : > { %1583 = vtanh.f32 %v1145_v17  ;;  %v958_v24 = vadd.f32 %v957_v19, %v815_v18  ;;  %1245 = vadd.xlane.f32.xlu0 %v1244_v20  ;;  %1215 = vadd.xlane.f32.xlu2 %v1214_v34  ;;  %v788_v25 = vpop.f32.mrf.mxu0  ;;  %v1114_v18 = vmul.f32 %v1846_v35, %v1086_v9 }
  0xbf   : > { %v930_v26 = vpop.f32.mrf.mxu1  ;;  %v1217_v46 = vsel %vm1204_vm7, %v1188_v30, 0.0  ;;  %v1091_v30 = vpop.permute.xlu1 %1090 }
  0xc0   : > { %v1131_v28 = vadd.f32 %v1111_v23, %v958_v24  ;;  %v931_v29 = vadd.f32 %v930_v26, %v788_v25  ;;  %v1105_v23 = vmul.f32 %v1846_v35, %v1867_v56  ;;  %v1113_v24 = vmul.f32 %v1846_v35, %v1081_v14 }
  0xc1   : > { %v1115_v56 = vmul.f32 %v1846_v35, %v1091_v30 }
  0xc2   : > { %v1582_v31 = vpop.eup %1581  ;;  %v1155_v32 = vadd.f32 %v1852_v42, %v1131_v28  ;;  %v1122_v33 = vadd.f32 %v1102_v27, %v931_v29 }
  0xc3   : > { %v1198_v36 = vmul.f32 %v1582_v31, %v1865_v54 }
  0xc4   : > { %v1584_v38 = vpop.eup %1583  ;;  %1585 = vtanh.f32 %v1155_v32  ;;  %v1146_v39 = vadd.f32 %v1852_v42, %v1122_v33  ;;  %v818_v40 = vpop.f32.mrf.mxu2 }
  0xc5   : > { %v960_v41 = vpop.f32.mrf.mxu3  ;;  %v1247_v44 = vsel %vm1204_vm7, %v1198_v36, 0.0  ;;  %v1189_v47 = vmul.f32 %v1584_v38, %v1865_v54 }
  0xc6   : > { %1587 = vtanh.f32 %v1146_v39  ;;  %v961_v49 = vadd.f32 %v960_v41, %v818_v40  ;;  %1248 = vadd.xlane.f32.xlu1 %v1247_v44  ;;  %1218 = vadd.xlane.f32.xlu2 %v1217_v46  ;;  %v791_v50 = vpop.f32.mrf.mxu0 }
  0xc7   : > { %v933_v51 = vpop.f32.mrf.mxu1  ;;  %v1220_v52 = vsel %vm1204_vm7, %v1189_v47, 0.0 }
  0xc8   : > { %v1132_v55 = vadd.f32 %v1112_v48, %v961_v49  ;;  %v934_v57 = vadd.f32 %v933_v51, %v791_v50  ;;  %1221 = vadd.xlane.f32.xlu0 %v1220_v52 }
  0xca   : > { %v1586_v58 = vpop.eup %1585  ;;  %v1156_v59 = vadd.f32 %v1852_v42, %v1132_v55  ;;  %v1123_v60 = vadd.f32 %v1103_v53, %v934_v57 }
  0xcb   : > { %v1199_v61 = vmul.f32 %v1586_v58, %v1865_v54 }
  0xcc   : > { %v1588_v62 = vpop.eup %1587  ;;  %1589 = vtanh.f32 %v1156_v59  ;;  %v1147_v63 = vadd.f32 %v1852_v42, %v1123_v60  ;;  %v821_v0 = vpop.f32.mrf.mxu2 }
  0xcd   : > { %v963_v22 = vpop.f32.mrf.mxu3  ;;  %v1250_v1 = vsel %vm1204_vm7, %v1199_v61, 0.0  ;;  %v1190_v2 = vmul.f32 %v1588_v62, %v1865_v54 }
  0xce   : > { %1591 = vtanh.f32 %v1147_v63  ;;  %1251 = vadd.xlane.f32.xlu2 %v1250_v1  ;;  %v794_v45 = vpop.f32.mrf.mxu0  ;;  %v964_v43 = vadd.f32 %v963_v22, %v821_v0 }
  0xcf   : > { %v936_v3 = vpop.f32.mrf.mxu1  ;;  %v1223_v4 = vsel %vm1204_vm7, %v1190_v2, 0.0 }
  0xd0   : > { %v937_v6 = vadd.f32 %v936_v3, %v794_v45  ;;  %1224 = vadd.xlane.f32.xlu1 %v1223_v4  ;;  %v1133_v27 = vadd.f32 %v1113_v24, %v964_v43 }
  0xd2   : > { %v1590_v7 = vpop.eup %1589  ;;  %v1124_v8 = vadd.f32 %v1104_v5, %v937_v6  ;;  %v1157_v38 = vadd.f32 %v1852_v42, %v1133_v27 }
  0xd3   : > { %v1200_v10 = vmul.f32 %v1590_v7, %v1865_v54 }
  0xd4   : > { %v1592_v11 = vpop.eup %1591  ;;  %v1148_v12 = vadd.f32 %v1852_v42, %v1124_v8  ;;  %v824_v13 = vpop.f32.mrf.mxu2 }
  0xd5   : > { %v966_v15 = vpop.f32.mrf.mxu3  ;;  %v1253_v16 = vsel %vm1204_vm7, %v1200_v10, 0.0  ;;  %v1191_v17 = vmul.f32 %v1592_v11, %v1865_v54 }
  0xd6   : > { %1593 = vtanh.f32 %v1148_v12  ;;  %v967_v19 = vadd.f32 %v966_v15, %v824_v13  ;;  %1254 = vadd.xlane.f32.xlu0 %v1253_v16  ;;  %v797_v20 = vpop.f32.mrf.mxu0 }
  0xd7   : > { %v939_v34 = vpop.f32.mrf.mxu1  ;;  %v1226_v21 = vsel %vm1204_vm7, %v1191_v17, 0.0  ;;  %v1309_v58 = vpop.xlane.xlu2 %1308 }
  0xd8   : > { %v1134_v25 = vadd.f32 %v1114_v18, %v967_v19  ;;  %v940_v26 = vadd.f32 %v939_v34, %v797_v20  ;;  %1227 = vadd.xlane.f32.xlu2 %v1226_v21 }
  0xda   : > { %v1158_v28 = vadd.f32 %v1852_v42, %v1134_v25  ;;  %v1125_v29 = vadd.f32 %v1105_v23, %v940_v26 }
  0xdc   : > { %v1594_v31 = vpop.eup %1593  ;;  %1595 = vtanh.f32 %v1158_v28  ;;  %v1149_v32 = vadd.f32 %v1852_v42, %v1125_v29  ;;  %v827_v33 = vpop.f32.mrf.mxu2 }
  0xdd   : > { %v969_v37 = vpop.f32.mrf.mxu3  ;;  %v1192_v36 = vmul.f32 %v1594_v31, %v1865_v54  ;;  %v1331_v59 = vpop.xlane.xlu0 %1330 }
  0xde   : > { %1597 = vtanh.f32 %v1149_v32  ;;  %v970_v39 = vadd.f32 %v969_v37, %v827_v33  ;;  %v1335_v61 = vsub.f32 %v1309_v58, %v1331_v59 }
  0xdf   : > { %v1229_v40 = vsel %vm1204_vm7, %v1192_v36, 0.0  ;;  %1599 = vtanh.f32 %v1157_v38  ;;  %v1334_v60 = vpop.xlane.xlu2 %1333 }
  0xe0   : > { %v1135_v41 = vadd.f32 %v1115_v56, %v970_v39  ;;  %1230 = vadd.xlane.f32.xlu0 %v1229_v40  ;;  %1337 = vst.msk [vmem:[%s644_s19] sm:$0xff] %vm1265_vm8, %v1335_v61 }
  0xe2   : > { %v1596_v44 = vpop.eup %1595  ;;  %v1159_v46 = vadd.f32 %v1852_v42, %v1135_v41 }
  0xe3   : > { %v1202_v47 = vmul.f32 %v1596_v44, %v1865_v54 }
  0xe4   : > { %v1598_v48 = vpop.eup %1597  ;;  %1601 = vtanh.f32 %v1159_v46 }
  0xe5   : > { %v1259_v35 = vsel %vm1204_vm7, %v1202_v47, 0.0  ;;  %v1193_v49 = vmul.f32 %v1598_v48, %v1865_v54  ;;  %v1600_v51 = vpop.eup %1599 }
  0xe6   : > { %1260 = vadd.xlane.f32.xlu2 %v1259_v35  ;;  %v1201_v55 = vmul.f32 %v1600_v51, %v1865_v54 }
  0xe7   : > { %v1232_v50 = vsel %vm1204_vm7, %v1193_v49, 0.0 }
  0xe8   : > { %1233 = vadd.xlane.f32.xlu1 %v1232_v50  ;;  %v1256_v57 = vsel %vm1204_vm7, %v1201_v55, 0.0 }
  0xea   : > { %v1602_v52 = vpop.eup %1601 }
  0xeb   : > { %v1203_v53 = vmul.f32 %v1602_v52, %v1865_v54  ;;  %v1312_v54 = vpop.xlane.xlu1 %1311 }
  0xec   : > { %v1336_v62 = vsub.f32 %v1312_v54, %v1334_v60 }
  0xed   : > { %v1262_v42 = vsel %vm1204_vm7, %v1203_v53, 0.0 }
  0xee   : > { %1263 = vadd.xlane.f32.xlu0 %v1262_v42  ;;  %1338 = vst.msk [vmem:[%s644_s19 + $0x8] sm:$0xff] %vm1265_vm8, %v1336_v62 }
  0xf0   : > { %1257 = vadd.xlane.f32.xlu1 %v1256_v57 }
 0x113   : > { %v1207_v63 = vpop.xlane.xlu2 %1206 }
 0x114   : > { %1266 = vst.msk [vmem:[%s1964_s28] sm:$0xff] %vm1265_vm8, %v1207_v63 }
 0x11e   : > { %v1237_v0 = vpop.xlane.xlu0 %1236 }
 0x11f   : > { %1276 = vst.msk [vmem:[%s1964_s28 + $0x50] sm:$0xff] %vm1265_vm8, %v1237_v0 }
 0x121   : > { %v1240_v22 = vpop.xlane.xlu1 %1239 }
 0x122   : > { %1277 = vst.msk [vmem:[%s1964_s28 + $0x58] sm:$0xff] %vm1265_vm8, %v1240_v22 }
 0x126   : > { %v1210_v1 = vpop.xlane.xlu0 %1209 }
 0x127   : > { %1267 = vst.msk [vmem:[%s1964_s28 + $0x8] sm:$0xff] %vm1265_vm8, %v1210_v1 }
 0x129   : > { %v1213_v2 = vpop.xlane.xlu1 %1212  ;;  %v1243_v45 = vpop.xlane.xlu2 %1242 }
 0x12a   : > { %1268 = vst.msk [vmem:[%s1964_s28 + $0x10] sm:$0xff] %vm1265_vm8, %v1213_v2 }
 0x12b   : > { %1278 = vst.msk [vmem:[%s1964_s28 + $0x60] sm:$0xff] %vm1265_vm8, %v1243_v45 }
 0x131   : > { %v1246_v3 = vpop.xlane.xlu0 %1245  ;;  %v1216_v4 = vpop.xlane.xlu2 %1215 }
 0x132   : > { %1279 = vst.msk [vmem:[%s1964_s28 + $0x68] sm:$0xff] %vm1265_vm8, %v1246_v3 }
 0x133   : > { %1269 = vst.msk [vmem:[%s1964_s28 + $0x18] sm:$0xff] %vm1265_vm8, %v1216_v4 }
 0x139   : > { %v1249_v5 = vpop.xlane.xlu1 %1248  ;;  %v1219_v6 = vpop.xlane.xlu2 %1218 }
 0x13a   : > { %1280 = vst.msk [vmem:[%s1964_s28 + $0x70] sm:$0xff] %vm1265_vm8, %v1249_v5 }
 0x13b   : > { %1270 = vst.msk [vmem:[%s1964_s28 + $0x20] sm:$0xff] %vm1265_vm8, %v1219_v6  ;;  %v1222_v7 = vpop.xlane.xlu0 %1221 }
 0x13c   : > { %1271 = vst.msk [vmem:[%s1964_s28 + $0x28] sm:$0xff] %vm1265_vm8, %v1222_v7 }
 0x141   : > { %v1252_v8 = vpop.xlane.xlu2 %1251 }
 0x142   : > { %1281 = vst.msk [vmem:[%s1964_s28 + $0x78] sm:$0xff] %vm1265_vm8, %v1252_v8 }
 0x143   : > { %v1225_v9 = vpop.xlane.xlu1 %1224 }
 0x144   : > { %1272 = vst.msk [vmem:[%s1964_s28 + $0x30] sm:$0xff] %vm1265_vm8, %v1225_v9 }
 0x149   : > { %v1255_v10 = vpop.xlane.xlu0 %1254 }
 0x14a   : > { %1282 = vst.msk [vmem:[%s1964_s28 + $0x80] sm:$0xff] %vm1265_vm8, %v1255_v10 }
 0x14b   : > { %v1228_v11 = vpop.xlane.xlu2 %1227 }
 0x14c   : > { %1273 = vst.msk [vmem:[%s1964_s28 + $0x38] sm:$0xff] %vm1265_vm8, %v1228_v11 }
 0x153   : > { %v1231_v12 = vpop.xlane.xlu0 %1230 }
 0x154   : > { %1274 = vst.msk [vmem:[%s1964_s28 + $0x40] sm:$0xff] %vm1265_vm8, %v1231_v12 }
 0x159   : > { %v1261_v13 = vpop.xlane.xlu2 %1260 }
 0x15a   : > { %1284 = vst.msk [vmem:[%s1964_s28 + $0x90] sm:$0xff] %vm1265_vm8, %v1261_v13 }
 0x15b   : > { %v1234_v14 = vpop.xlane.xlu1 %1233 }
 0x15c   : > { %1275 = vst.msk [vmem:[%s1964_s28 + $0x48] sm:$0xff] %vm1265_vm8, %v1234_v14 }
 0x161   : > { %v1264_v15 = vpop.xlane.xlu0 %1263 }
 0x162   : > { %1285 = vst.msk [vmem:[%s1964_s28 + $0x98] sm:$0xff] %vm1265_vm8, %v1264_v15 }
 0x163   : > { %v1258_v16 = vpop.xlane.xlu1 %1257 }
 0x164   : > { %1283 = vst.msk [vmem:[%s1964_s28 + $0x88] sm:$0xff] %vm1265_vm8, %v1258_v16 }
 0x165 PF: > { %s24_s25 = sadd.s32 1, %s1609_s25  }
 0x166   : > { %p21_p7 = scmp.ge.s32.totalorder %s24_s25, 4  }
 0x168   :  { %23 = sbr.rel (!%p21_p7) target bundleno = 1 (0x1), region = 122 }

</bundles_post_ra>
